<compile_context>
chip_gen: v6e
topology: v6e:2x2x1
jax: 0.10.0
libtpu: 0.0.40
codegen_flags: <defaults>
</compile_context>

<pallas_src>
import functools

import jax
import jax.numpy as jnp
from jax import lax
from jax.experimental import pallas as pl
from jax.experimental.pallas import tpu as pltpu

_LANE = 128
_SUBLANE = 8
_NEG_LARGE = -1e30  # bias for padded action columns -> exp() underflows to 0


def _round_up(x, m):
    return ((x + m - 1) // m) * m


def _policy_kernel(x_ref, wt_ref, b_ref, out_ref, *, n_actions):
    # logits = x @ W_t + b with W_t in canonical (K, N) MXU layout; f32 accum.
    logits = lax.dot_general(
        x_ref[...],
        wt_ref[...],
        dimension_numbers=(((1,), (0,)), ((), ())),
        preferred_element_type=jnp.float32,
    ) + b_ref[...]

    # Numerically stable LogSoftmax(dim=-1) in f32. Padded columns carry a
    # -1e30 bias so they contribute exp(-1e30 - m) == 0 to the row sum and the
    # log-probs of the real actions are exact.
    m = jnp.max(logits, axis=-1, keepdims=True)
    shifted = logits - m
    lse = jnp.log(jnp.sum(jnp.exp(shifted), axis=-1, keepdims=True))
    logp = shifted - lse

    # Store only the real actions (true-width output; padding never hits HBM).
    out_ref[...] = logp[:, :n_actions].astype(out_ref.dtype)


def discrete_policy_forward(x, weight, bias, *, tile_b=1024):
    """x: (B, in_features); weight: (n_actions, in_features); bias: (n_actions,).

    Returns log-probabilities of shape (B, n_actions).
    """
    B, in_features = x.shape
    n_actions = weight.shape[0]
    dtype = x.dtype

    # Lane-dense action dimension for the MXU / softmax compute only.
    n_pad = _round_up(max(n_actions, 1), _LANE)

    # Per-generation VMEM budget (v5e/v6e: 128 MiB, v7x: 64 MiB per TC).
    try:
        vmem_cap = int(pltpu.get_tpu_info().vmem_capacity_bytes)
    except Exception:
        vmem_cap = 64 * 1024 * 1024  # conservative fallback (v7x per-TC)
    budget = min((vmem_cap * 3) // 4, 96 * 1024 * 1024)

    row_mult = 16 if dtype == jnp.bfloat16 else _SUBLANE
    out_itemsize = jnp.dtype(dtype).itemsize

    def _vmem_bytes(tb):
        # Every input/output BlockSpec is double-buffered by default, even the
        # constant-index (resident) W and bias blocks.
        x_bytes = 2 * tb * in_features * x.dtype.itemsize
        w_bytes = 2 * in_features * n_pad * weight.dtype.itemsize
        b_bytes = 2 * n_pad * 4
        o_bytes = 2 * tb * n_actions * out_itemsize
        tmp_bytes = 4 * tb * n_pad * 4  # f32 logits / softmax temporaries
        return x_bytes + w_bytes + b_bytes + o_bytes + tmp_bytes

    # Batch tile: multiple of 8 rows (16 for bf16), capped at ceil(B/2) so the
    # parallel grid has >= 2 steps (v7x dual TensorCore), shrunk to fit budget.
    tile = min(tile_b, B)
    if B > row_mult:
        tile = min(tile, -(-B // 2))
    tile = max(row_mult, _round_up(tile, row_mult))
    while tile > row_mult and _vmem_bytes(tile) > budget:
        tile = max(row_mult, _round_up(tile // 2, row_mult))

    vmem_limit = min(vmem_cap, max(_vmem_bytes(tile) + (8 << 20), 32 << 20))

    # One-time wrapper-side prep: W^T in (K, N) layout, padded action columns
    # get zero weights and a very negative bias.
    w_t = weight.T
    if n_pad != n_actions:
        w_t = jnp.pad(w_t, ((0, 0), (0, n_pad - n_actions)))
        b_p = jnp.concatenate(
            [bias.astype(jnp.float32),
             jnp.full((n_pad - n_actions,), _NEG_LARGE, dtype=jnp.float32)]
        )
    else:
        b_p = bias.astype(jnp.float32)
    b2d = b_p.reshape(1, n_pad)

    grid = (pl.cdiv(B, tile),)  # ragged last block handled by Pallas

    kernel = functools.partial(_policy_kernel, n_actions=n_actions)

    out = pl.pallas_call(
        kernel,
        out_shape=jax.ShapeDtypeStruct((B, n_actions), dtype),
        grid=grid,
        in_specs=[
            pl.BlockSpec((tile, in_features), lambda i: (i, 0)),   # streamed x
            pl.BlockSpec((in_features, n_pad), lambda i: (0, 0)),  # resident W^T
            pl.BlockSpec((1, n_pad), lambda i: (0, 0)),            # resident bias
        ],
        out_specs=pl.BlockSpec((tile, n_actions), lambda i: (i, 0)),
        compiler_params=pltpu.CompilerParams(
            dimension_semantics=("parallel",),
            vmem_limit_bytes=vmem_limit,
        ),
    )(x, w_t, b2d)

    return out


def init_params(key, in_features, n_actions, dtype=jnp.float32):
    """Deterministic init mirroring nn.Linear's default U(-1/sqrt(in), 1/sqrt(in))."""
    kw, kb = jax.random.split(key)
    bound = 1.0 / (in_features ** 0.5)
    weight = jax.random.uniform(
        kw, (n_actions, in_features), dtype=dtype, minval=-bound, maxval=bound
    )
    bias = jax.random.uniform(
        kb, (n_actions,), dtype=dtype, minval=-bound, maxval=bound
    )
    return weight, bias


if __name__ == "__main__":
    key = jax.random.PRNGKey(0)
    k_x, k_p = jax.random.split(key)

    # Small shapes consistent with the module (bs, in_features) -> n_actions.
    # batch=20 exercises a 2-step grid with a ragged last block (20 % 16 != 0).
    batch, in_features, n_actions = 20, 32, 4

    x = jax.random.normal(k_x, (batch, in_features), dtype=jnp.float32) * 2.0
    weight, bias = init_params(k_p, in_features, n_actions)

    log_probs = discrete_policy_forward(x, weight, bias)
    jax.block_until_ready(log_probs)

    # Sanity check against pure-JAX reference.
    ref = jax.nn.log_softmax(x @ weight.T + bias, axis=-1)
    assert log_probs.shape == (batch, n_actions)
    assert jnp.allclose(log_probs, ref, atol=1e-5, rtol=1e-5), "mismatch vs reference"
    # log-probs must exponentiate-sum to 1 per row
    assert jnp.allclose(jnp.sum(jnp.exp(log_probs), axis=-1), 1.0, atol=1e-5)

    print("KERNEL_OK")
</pallas_src>

<mosaic_0001>
module attributes {stable_mosaic.version = 11 : i64} {
  func.func @_policy_kernel(%arg0: i32, %arg1: memref<16x32xf32, #tpu.memory_space<vmem>>, %arg2: memref<32x128xf32, #tpu.memory_space<vmem>>, %arg3: memref<1x128xf32, #tpu.memory_space<vmem>>, %arg4: memref<16x4xf32, #tpu.memory_space<vmem>>) attributes {dimension_semantics = [#tpu.dimension_semantics<parallel>], iteration_bounds = array<i64: 2>, scalar_prefetch = 0 : i64, scratch_operands = 0 : i64, tpu.core_type = #tpu.core_type<tc>, window_params = [{transform_indices = @transform_0, window_bounds = array<i64: 16, 32>}, {pipeline_mode = #tpu.pipeline_mode<synchronous>, transform_indices = @transform_1, window_bounds = array<i64: 32, 128>}, {pipeline_mode = #tpu.pipeline_mode<synchronous>, transform_indices = @transform_2, window_bounds = array<i64: 1, 128>}, {transform_indices = @transform_3, window_bounds = array<i64: 16, 4>}]} {
    %c0 = arith.constant 0 : index
    %c0_0 = arith.constant 0 : index
    %0 = vector.load %arg1[%c0, %c0_0] : memref<16x32xf32, #tpu.memory_space<vmem>>, vector<16x32xf32>
    %c0_1 = arith.constant 0 : index
    %c0_2 = arith.constant 0 : index
    %1 = vector.load %arg2[%c0_1, %c0_2] : memref<32x128xf32, #tpu.memory_space<vmem>>, vector<32x128xf32>
    %cst = arith.constant dense<0.000000e+00> : vector<16x128xf32>
    %2 = tpu.matmul %0, %1, %cst {dimension_numbers = #tpu.dot_dimension_numbers<[1], [0], [0], [1], [0, 0, 1, 1], [], []>} : vector<16x32xf32>, vector<32x128xf32>, vector<16x128xf32> -> vector<16x128xf32>
    %c0_3 = arith.constant 0 : index
    %c0_4 = arith.constant 0 : index
    %3 = vector.load %arg3[%c0_3, %c0_4] : memref<1x128xf32, #tpu.memory_space<vmem>>, vector<1x128xf32>
    %4 = vector.broadcast %3 : vector<1x128xf32> to vector<16x128xf32>
    %5 = arith.addf %2, %4 : vector<16x128xf32>
    %cst_5 = arith.constant dense<0xFF800000> : vector<16xf32>
    %6 = vector.multi_reduction <maximumf>, %5, %cst_5 [1] : vector<16x128xf32> to vector<16xf32>
    %7 = vector.shape_cast %6 : vector<16xf32> to vector<16x1xf32>
    %8 = vector.broadcast %7 : vector<16x1xf32> to vector<16x128xf32>
    %9 = arith.subf %5, %8 : vector<16x128xf32>
    %10 = math.exp %9 : vector<16x128xf32>
    %cst_6 = arith.constant dense<0.000000e+00> : vector<16xf32>
    %11 = vector.multi_reduction <add>, %10, %cst_6 [1] : vector<16x128xf32> to vector<16xf32>
    %12 = vector.shape_cast %11 : vector<16xf32> to vector<16x1xf32>
    %13 = math.log %12 : vector<16x1xf32>
    %14 = vector.broadcast %13 : vector<16x1xf32> to vector<16x128xf32>
    %15 = arith.subf %9, %14 : vector<16x128xf32>
    %16 = vector.extract_strided_slice %15 {offsets = [0, 0], sizes = [16, 4], strides = [1, 1]} : vector<16x128xf32> to vector<16x4xf32>
    %c0_7 = arith.constant 0 : index
    %c0_8 = arith.constant 0 : index
    %17 = vector.load %arg4[%c0_7, %c0_8] : memref<16x4xf32, #tpu.memory_space<vmem>>, vector<16x4xf32>
    tpu.vector_store %arg4[%c0_7, %c0_8], %16 {strides = array<i32>} : memref<16x4xf32, #tpu.memory_space<vmem>>, vector<16x4xf32>,
    return
  }
  func.func @transform_0(%arg0: i32) -> (i32, i32) {
    %c0_i32 = arith.constant 0 : i32
    %c0_i32_0 = arith.constant 0 : i32
    return %arg0, %c0_i32 : i32, i32
  }
  func.func @transform_1(%arg0: i32) -> (i32, i32) {
    %c0_i32 = arith.constant 0 : i32
    %c0_i32_0 = arith.constant 0 : i32
    %c0_i32_1 = arith.constant 0 : i32
    return %c0_i32, %c0_i32_0 : i32, i32
  }
  func.func @transform_2(%arg0: i32) -> (i32, i32) {
    %c0_i32 = arith.constant 0 : i32
    %c0_i32_0 = arith.constant 0 : i32
    %c0_i32_1 = arith.constant 0 : i32
    return %c0_i32, %c0_i32_0 : i32, i32
  }
  func.func @transform_3(%arg0: i32) -> (i32, i32) {
    %c0_i32 = arith.constant 0 : i32
    %c0_i32_0 = arith.constant 0 : i32
    return %arg0, %c0_i32 : i32, i32
  }
}

</mosaic_0001>

<bundles_post_ra>
// kernel: tpu_custom_call.1
= control target key start
LH: loop header
LB: loop body
LE: loop exit
PB: predicated region body
PF: predicated region fallthrough
CT: control target
= control target key end

     0   :  { %8 = vsyncpa [#allocation3], 0  ;;  %s1108_s0 = inlined_call_operand.hbm [shape: f32[20,32], index: 0, kind: input, shape index: {}]   ;;  %s1109_s1 = inlined_call_operand.hbm [shape: f32[32,128], index: 1, kind: input, shape index: {}]   ;;  %s1110_s2 = inlined_call_operand.vmem [shape: f32[1,128], index: 2, kind: input, shape index: {}]   ;;  %s1111_s3 = inlined_call_operand.vmem [shape: f32[20,4], index: 3, kind: output, shape index: {}]  }
   0x1   :  { %10 = vsyncpa [#allocation3 + $0x1], 0 }
   0x2   :  { %11 = vsyncpa [#allocation5], 0  ;;  %s933_s12 = smov 0   ;;  %s935_s13 = smov 0  }
   0x3   :  { %s937_s14 = smov 0   ;;  %s939_s15 = smov 0  }
   0x4 LB: > { %s952_s16 = sadd.s32 4294967295, %s873_s15   ;;  %s955_s17 = sadd.s32 1, %s873_s15   ;;  %s873_s15 = sphi %s939_s15, %s1122_s15   ;;  %s869_s14 = sphi %s937_s14, %s1121_s14   ;;  %s865_s13 = sphi %s935_s13, %s1120_s13   ;;  %s861_s12 = sphi %s933_s12, %s1119_s12  }
   0x5   : > { %s21_s18 = ssub.s32 %s873_s15, %s955_s17  ;;  %s24_s19 = sadd.s32 1, %s869_s14 }
   0x6   : > { %p22_p0 = scmp.eq.s32.totalorder %s21_s18, 0  ;;  %p31_p1 = scmp.ne.s32.totalorder %s869_s14, %s865_s13 }
   0x7   : > { %p32_p2 = scmp.eq.s32.totalorder %s873_s15, 0  ;;  %p37_p3 = scmp.ne.s32.totalorder %s865_s13, %s861_s12 }
   0x8   : > { %s965_s20 = scalar_select %p22_p0, %s869_s14, %s24_s19  }
   0x9   : > { %p967_p4 = por %p32_p2, %p31_p1  ;;  %p38_p5 = scmp.eq.s32.totalorder %s952_s16, 0 }
   0xa   : > { %p103_p6 = scmp.eq.s32.totalorder %s952_s16, 1  ;;  %p576_p7 = scmp.ge.s32.totalorder %s873_s15, 1 }
   0xb   : > { %p976_p8 = por %p38_p5, %p37_p3  ;;  %p116_p9 = scmp.lt.s32.totalorder %s873_s15, 3 }
   0xc   : > { %p981_p10 = por %p103_p6, %p31_p1  ;;  %s907_s25 = smov [#allocation4]  }
   0xd   : > { %s1114_s22 = scalar_select %p976_p8, 1, 0 }
   0xe   : > { %s1115_s23 = scalar_select %p981_p10, 1, 0 }
   0xf   : > { %p985_p11 = pnand %p576_p7, %p116_p9  ;;  %s128_s26 = sshll.u32 %s907_s25, 4  ;;  %s129_s26 = int_to_ptr.vmem [resolvable:$true] %s128_s26 }
  0x10   : > { %s762_s27 = scalar_lea.vmem %s129_s26, 512  ;;  %p770_p6 = scmp.lt.s32.totalorder %s129_s26, %s129_s26 }
  0x11   : > { %p636_p12 = pneg %p985_p11  ;;  %p763_p2 = scmp.ne.s32.totalorder %s129_s26, %s762_s27 }
  0x12   : > { %p771_p8 = scmp.lt.s32.totalorder %s762_s27, %s762_s27 }
  0x13   : > { %p637_p13 = pnand %p636_p12, %p38_p5 }
  0x14   : > { %p772_p10 = por %p771_p8, %p770_p6 }
  0x15   : > { %p753_p0 = pneg %p637_p13 }
  0x17   : > { %p765_p3 = pnand %p763_p2, %p753_p0 }
  0x19   : > { %p766_p1 = pneg %p765_p3 }
  0x1b   : > { %p773_p7 = pnand %p772_p10, %p766_p1 }
  0x1d   : > { %776 = shalt.err (!%p773_p7)
}
  0x1e   : > { %s908_s28 = smov 128   ;;  %s909_s29 = smov 8  }
  0x1f   : > { %639 = dma.hbm_to_vmem [thread:$0]  (!%p637_p13), %s1109_s1, 512, %s129_s26, [#allocation5], %s908_s28, %s908_s28, %s909_s29  }
  0x20   : > { %p578_p9 = scmp.ge.s32.totalorder %s873_s15, 2 }
  0x22   : > { %141 = sbr.rel (%p578_p9) target bundleno = 71 (0x47), region = 24 }
  0x27   : > { %144 = sbr.rel (!%p967_p4) target bundleno = 71 (0x47), region = 28  ;;  %s145_s5 = sand.u32 (%p967_p4), 1, %s869_s14  }
  0x28   : > { %s580_s6 = sshll.u32 (%p967_p4), %s873_s15, 1  ;;  %s579_s7 = sshll.u32 (%p967_p4), %s145_s5, 4 }
  0x29   : > { %s151_s8 = ssub.s32 (%p967_p4), 3, %s580_s6  ;;  %s1004_s11 = scalar_lea.sflag (%p967_p4), [#allocation3], %s145_s5 }
  0x2a   : > { %p152_p8 = scmp.lt.s32.totalorder (%p967_p4), %s151_s8, 2  ;;  %s149_s12 = scalar_lea.vmem (%p967_p4), [#allocation2], %s579_s7 }
  0x2c   : > { %s1124_s8 = smov (!%p152_p8, %s151_s8), 2 }
  0x2d   : > { %s1001_s9 = sshll.u32 %s1124_s8, 7 }
  0x2e   : > { %s156_s10 = ssub.s32 256, %s1001_s9 }
  0x2f   : > { %157 = vsyncadd %s1004_s11, %s156_s10  ;;  %p582_p4 = scmp.ne.s32.totalorder %s1001_s9, 0  ;;  %s610_s18 = sshll.u32 %s873_s15, 8 }
  0x30   : > { %s1012_s25 = scalar_lea.hbm %s1108_s0, %s610_s18  ;;  %s162_s26 = sshll.u32 %s149_s12, 4  ;;  %s1014_s26 = int_to_ptr.vmem [resolvable:$true] %s162_s26 }
  0x31   : > { %s777_s27 = scalar_lea.hbm %s1012_s25, %s1001_s9  ;;  %s781_s15 = scalar_lea.hbm %s1108_s0, 384 }
  0x32   : > { %p778_p10 = scmp.ne.s32.totalorder %s1012_s25, %s777_s27  ;;  %p782_p0 = scmp.lt.s32.totalorder %s1012_s25, %s1108_s0 }
  0x33   : > { %p783_p2 = scmp.lt.s32.totalorder %s781_s15, %s777_s27 }
  0x34   : > { %p779_p12 = pnand %p778_p10, %p582_p4 }
  0x35   : > { %p784_p3 = por %p783_p2, %p782_p0 }
  0x36   : > { %p780_p13 = pneg %p779_p12 }
  0x38   : > { %p785_p1 = pnand %p784_p3, %p780_p13 }
  0x3a   : > { %788 = shalt.err (!%p785_p1)
}
  0x3b   : > { %s789_s5 = scalar_lea.vmem %s1014_s26, %s1001_s9  ;;  %s910_s6 = smov [#allocation2]  }
  0x3c   : > { %p790_p6 = scmp.ne.s32.totalorder %s1014_s26, %s789_s5  ;;  %s793_s7 = sshll.u32 %s910_s6, 4  ;;  %s794_s7 = int_to_ptr.vmem [resolvable:$false] %s793_s7 }
  0x3d   : > { %s795_s8 = scalar_lea.vmem %s794_s7, 512  ;;  %p796_p8 = scmp.lt.s32.totalorder %s1014_s26, %s794_s7 }
  0x3e   : > { %p791_p7 = pnand %p790_p6, %p582_p4  ;;  %p797_p10 = scmp.lt.s32.totalorder %s795_s8, %s789_s5 }
  0x40   : > { %p792_p9 = pneg %p791_p7  ;;  %p798_p12 = por %p797_p10, %p796_p8 }
  0x42   : > { %p799_p0 = pnand %p798_p12, %p792_p9 }
  0x44   : > { %802 = shalt.err (!%p799_p0)
}
  0x45   : > { %s911_s10 = smov 128   ;;  %s912_s12 = smov 8  }
  0x46   : > { %168 = dma.hbm_to_vmem [thread:$0]  (%p582_p4), %s1012_s25, %s1001_s9, %s1014_s26, %s1004_s11, %s911_s10, %s911_s10, %s912_s12  }
  0x47 PF: > { %174 = sbr.rel (%p985_p11) target bundleno = 641 (0x281), region = 32  ;;  %s176_s18 = sand.u32 (!%p985_p11), 1, %s865_s13  }
  0x48   : > { %s1043_s19 = sshll.u32 (!%p985_p11), %s176_s18, 4  ;;  %s177_s21 = scalar_lea.sflag (!%p985_p11), [#allocation3], %s176_s18 }
  0x49   : > { %s180_s27 = scalar_lea.vmem (!%p985_p11), [#allocation2], %s1043_s19  ;;  %p1117_p13 = scmp.ne.s32.totalorder (!%p985_p11), %s1114_s22, 0 }
  0x4c   : > { %852 = dma.done.wait (%p1117_p13), %s177_s21, 256  }
  0x4d   : > { %854 = vsyncadd (%p1117_p13), %s177_s21, 4294967040 }
  0x4e   : > { %856 = dma.done.wait (%p38_p5), [#allocation5], 512  }
  0x4f   : > { %858 = vsyncadd (%p38_p5), [#allocation5], 4294966784  ;;  %vm229_vm0 = vcmask 261120   ;;  %v221_v0 = vld [vmem:[#allocation4 + $0x18] sm:$0xff]  ;;  %v220_v1 = vld [vmem:[#allocation4 + $0x10] sm:$0xff]  ;;  %vm331_vm1 = vcmask 31744  }
  0x50   : > { %620 = vmatprep.subr.mxu0 %v221_v0  ;;  %v216_v2 = vld [vmem:[%s180_s27] sm:$0xff]  ;;  %v219_v3 = vld [vmem:[#allocation4 + $0x8] sm:$0xff]  ;;  %s1060_s9 = scalar_lea.vmem [#allocation6], %s1043_s19   ;;  %p1118_p5 = scmp.ne.s32.totalorder %s1115_s23, 0 }
  0x51   : > { %621 = vmatpush3.msra.mxu0 %v221_v0  ;;  %628 = vmatprep.mubr.msk.f32.mxu0 %vm229_vm0, %v216_v2  ;;  %v218_v4 = vld [vmem:[#allocation4] sm:$0xff]  ;;  %v217_v5 = vld [vmem:[%s180_s27 + $0x8] sm:$0xff]  ;;  %s594_s11 = sshll.u32 (%p1118_p5), %s952_s16, 1  ;;  %s611_s25 = sshll.u32 (%p1118_p5), %s952_s16, 4 }
  0x52   : > { %622 = vmatprep.subr.mxu0 %v220_v1  ;;  %v590_v7 = vld [vmem:[%s1110_s2] ss:$0 sm:$0xff]  ;;  %s342_s26 = ssub.s32 (%p1118_p5), 3, %s594_s11  ;;  %s1071_s15 = scalar_lea.vmem (%p1118_p5), %s1111_s3, %s611_s25  }
  0x53   : > { %623 = vmatpush3.msra.mxu0 %v220_v1  ;;  %p343_p11 = scmp.lt.s32.totalorder (%p1118_p5), %s342_s26, 2 }
  0x54   : > { %624 = vmatprep.subr.mxu0 %v219_v3 }
  0x55   : > { %625 = vmatpush3.msra.mxu0 %v219_v3 }
  0x56   : > { %626 = vmatprep.subr.mxu0 %v218_v4 }
  0x57   : > { %627 = vmatpush3.msra.mxu0 %v218_v4 }
  0x58   : > { %629 = vmatmul.mubr.msk.f32.vlgmr.msra.gmra.mxu0 %vm229_vm0, %v217_v5 }
 0x118   : > { %v630_v6 = vpop.f32.mrf.mxu0 }
 0x119   : > { %v308_v10 = vadd.f32 %v630_v6, %v590_v7 }
 0x11a   : > { %v302_v8 = vpop.f32.mrf.mxu0 }
 0x11b   : > { %v303_v9 = vadd.f32 %v590_v7, %v302_v8 }
 0x11d   : > { %311 = vmax.xlane.f32.xlu0 %v303_v9 }
 0x121   : > { %313 = vmax.xlane.f32.xlu0 %v308_v10 }
 0x1a6   : > { %v312_v11 = vpop.xlane.xlu0 %311 }
 0x1a7   : > { %v315_v12 = vsub.f32 %v303_v9, %v312_v11 }
 0x1a9   : > { %v317_v13 = vmul.f32 1.442695, %v315_v12 }
 0x1aa   : > { %v314_v14 = vpop.xlane.xlu0 %313 }
 0x1ab   : > { %v316_v15 = vsub.f32 %v308_v10, %v314_v14  ;;  %743 = vpow2.f32 %v317_v13 }
 0x1ad   : > { %v319_v16 = vmul.f32 1.442695, %v316_v15 }
 0x1af   : > { %745 = vpow2.f32 %v319_v16 }
 0x1b8   : > { %v744_v17 = vpop.eup %743 }
 0x1b9   : > { %321 = vadd.xlane.f32.xlu1 %v744_v17 }
 0x1bc   : > { %v746_v18 = vpop.eup %745 }
 0x1bd   : > { %323 = vadd.xlane.f32.xlu1 %v746_v18 }
 0x242   : > { %v322_v19 = vpop.xlane.xlu1 %321 }
 0x243   : > { %747 = vlog2.f32 %v322_v19 }
 0x246   : > { %v324_v20 = vpop.xlane.xlu1 %323 }
 0x247   : > { %749 = vlog2.f32 %v324_v20 }
 0x250   : > { %v748_v21 = vpop.eup %747 }
 0x251   : > { %v326_v22 = vmul.f32 0.6931472, %v748_v21 }
 0x253   : > { %v329_v23 = vsub.f32 %v315_v12, %v326_v22 }
 0x254   : > { %v750_v24 = vpop.eup %749 }
 0x255   : > { %332 = vst.msk [vmem:[%s1060_s9] sm:$0xff] %vm331_vm1, %v329_v23  ;;  %v328_v25 = vmul.f32 0.6931472, %v750_v24  ;;  %340 = sbr.rel (!%p1118_p5) target bundleno = 641 (0x281), region = 44 }
 0x257   : > { %v330_v26 = vsub.f32 %v316_v15, %v328_v25 }
 0x259   : > { %333 = vst.msk [vmem:[%s1060_s9 + $0x8] sm:$0xff] %vm331_vm1, %v330_v26 }
 0x25a   : > { %s1126_s26 = smov (!%p343_p11, %s342_s26), 2 }
 0x25b   : > { %s595_s30 = sshll.u32 %s1126_s26, 7 }
 0x25c   : > { %p598_p4 = scmp.eq.s32.totalorder %s595_s30, 0 }
 0x25d   : > { %s1077_s23 = sshrl.u32 (!%p598_p4), %s1126_s26, 1 }
 0x25e   : > { %351 = sbr.rel (%p598_p4) target bundleno = 641 (0x281), region = 48  ;;  %p599_p2 = scmp.le.s32.totalorder (!%p598_p4), %s1077_s23, 0 }
 0x263   : > { %519 = sbr.rel (%p599_p2) target bundleno = 624 (0x270), region = 130  ;;  %s875_s16 = smov (!%p599_p2), %s1071_s15  }
 0x264   : > { %s879_s4 = smov (!%p599_p2), %s1060_s9   ;;  %s883_s5 = smov (!%p599_p2), 0  }
 0x265   : > { %s887_s6 = smov (!%p599_p2), 0  }
 0x268 LB: >> { %v416_v27 = vld [vmem:[%s881_s4] sm:$0xff]  ;;  %v418_v28 = vld [vmem:[%s881_s4 + $0x8] sm:$0xff]  ;;  %s420_s7 = sadd.s32 1, %s885_s5  ;;  %s410_s6 = sadd.s32 1, %s889_s6   ;;  %s889_s6 = sphi %s887_s6, %s410_s6   ;;  %s885_s5 = sphi %s883_s5, %s884_s5   ;;  %s881_s4 = sphi %s879_s4, %s425_s4   ;;  %s877_s16 = sphi %s875_s16, %s426_s16  }
 0x269   : >> { %417 = vst [vmem:[%s877_s16] sm:$0xff] %v416_v27  ;;  %419 = vst [vmem:[%s877_s16 + $0x8] sm:$0xff] %v418_v28  ;;  %p421_p3 = scmp.ge.s32.totalorder %s420_s7, %s1077_s23  ;;  %p409_p1 = scmp.ge.s32.totalorder %s410_s6, %s1077_s23 }
 0x26b   : >> { %s1128_s7 = smov (%p421_p3, %s420_s7), 0  ;;  %412 = sbr.rel (!%p409_p1) target bundleno = 616 (0x268), region = 136 }
 0x26c   : >> { %s600_s8 = sshll.u32 %s1128_s7, 4  ;;  %s884_s5 = smov %s1128_s7  }
 0x26d   : >> { %s425_s4 = scalar_lea.vmem %s1060_s9, %s600_s8 [#allocation6]   ;;  %s426_s16 = scalar_lea.vmem %s1071_s15, %s600_s8  }
 0x270 PF: > { %s1087_s10 = sand.u32 1, %s1126_s26   ;;  %s612_s12 = sshll.u32 %s1077_s23, 4 }
 0x271   : > { %s431_s18 = scalar_lea.vmem %s1060_s9, %s612_s12 [#allocation6]   ;;  %s433_s19 = scalar_lea.vmem %s1071_s15, %s612_s12  }
 0x272   : > { %p605_p6 = scmp.le.s32.totalorder %s1087_s10, 0 }
 0x273   : > { %s891_s21 = smov (!%p605_p6), %s433_s19   ;;  %s895_s27 = smov (!%p605_p6), %s431_s18  }
 0x274   : > { %533 = sbr.rel (%p605_p6) target bundleno = 641 (0x281), region = 141  ;;  %s899_s22 = smov (!%p605_p6), 0  }
 0x275   : > { %s903_s24 = smov (!%p605_p6), 0  }
 0x279 LB: >> { %v443_v29 = vld [vmem:[%s897_s27] sm:$0xff]  ;;  %s445_s11 = sadd.s32 1, %s901_s22  ;;  %s437_s24 = sadd.s32 1, %s905_s24   ;;  %s905_s24 = sphi %s903_s24, %s437_s24   ;;  %s901_s22 = sphi %s899_s22, %s900_s22   ;;  %s897_s27 = sphi %s895_s27, %s450_s27   ;;  %s893_s21 = sphi %s891_s21, %s451_s21  }
 0x27a   : >> { %444 = vst [vmem:[%s893_s21] sm:$0xff] %v443_v29  ;;  %p446_p7 = scmp.ge.s32.totalorder %s445_s11, %s1087_s10  ;;  %p436_p9 = scmp.ge.s32.totalorder %s437_s24, %s1087_s10 }
 0x27c   : >> { %s1130_s11 = smov (%p446_p7, %s445_s11), 0  ;;  %439 = sbr.rel (!%p436_p9) target bundleno = 633 (0x279), region = 147 }
 0x27d   : >> { %s606_s9 = sshll.u32 %s1130_s11, 3  ;;  %s900_s22 = smov %s1130_s11  }
 0x27e   : >> { %s450_s27 = scalar_lea.vmem %s431_s18, %s606_s9 [#allocation6]   ;;  %s451_s21 = scalar_lea.vmem %s433_s19, %s606_s9  }
 0x281 PF: > { %p14_p8 = scmp.ge.s32.totalorder %s955_s17, 4   ;;  %s1119_s12 = smov %s865_s13 }
 0x282   : > { %s1120_s13 = smov %s869_s14  ;;  %s1121_s14 = smov %s965_s20 }
 0x283   : > { %s1122_s15 = smov %s955_s17  ;;  %16 = sbr.rel (!%p14_p8) target bundleno = 4 (0x4), region = 158 }
 0x288   :  { %467 = vsyncpa [#allocation3], 1 }
 0x289   :  { %469 = vsyncpa [#allocation3 + $0x1], 1 }
 0x28a   :  { %470 = vsyncpa [#allocation5], 1 }

</bundles_post_ra>
